<compile_context>
chip_gen: v7x
topology: tpu7x:2x2x1
jax: 0.10.0
libtpu: 0.0.40
codegen_flags: <defaults>
</compile_context>

<pallas_src>
import functools

import jax
import jax.numpy as jnp
from jax.experimental import pallas as pl
from jax.experimental.pallas import tpu as pltpu


def netl1_kernel(x_ref, w1_ref, b1_ref, w2n_ref, b2n_ref, o_ref, *,
                 epilogue_dtype):
    # ---- fc1 on the VPU: a K=2 contraction is far too small for the MXU.
    x = x_ref[...]                       # (TB, 2)   compute dtype
    w1 = w1_ref[...]                     # (2, 512)  compute dtype
    h = (x[:, 0:1] * w1[0:1, :]
         + x[:, 1:2] * w1[1:2, :]
         + b1_ref[...])                  # (TB, 512)
    h = jnp.maximum(h, 0)                # ReLU

    # ---- fc2 on the MXU: bf16 operands, f32 accumulate.  Weights/bias are
    # pre-negated, so z = -(h @ W2 + b2).
    z = jnp.dot(h.astype(jnp.bfloat16), w2n_ref[...],
                preferred_element_type=jnp.float32)      # (TB, 256) f32
    z = (z + b2n_ref[...]).astype(epilogue_dtype)

    # ---- sigmoid(y) = 1 / (1 + exp(-y)) = 1 / (1 + exp(z)) via the EUP.
    e = jnp.exp(z)                                       # EUP (bf16 on v6e/v7x)
    denom = (1.0 + e).astype(jnp.float32)
    o_ref[...] = pl.reciprocal(denom, approx=True).astype(o_ref.dtype)


def _round_up(n, m):
    return ((n + m - 1) // m) * m


def _device_kind():
    try:
        return jax.devices()[0].device_kind.lower()
    except Exception:
        return ""


def _vmem_capacity_bytes():
    try:
        return int(pltpu.get_tpu_info().vmem_capacity_bytes)
    except Exception:
        kind = _device_kind()
        return (64 << 20) if ("v7" in kind or "7x" in kind) else (128 << 20)


def _default_compute_dtype():
    kind = _device_kind()
    # bf16 VALU/EUP exist on v6e/v7x; keep f32 fc1/epilogue on v4/v5.
    if ("v6" in kind) or ("v7" in kind) or ("7x" in kind):
        return jnp.bfloat16
    return jnp.float32


def netl1_forward(x, w1, b1, w2n, b2n, *, block_b=None, compute_dtype=None):
    """Forward pass.  w2n/b2n are the PRE-NEGATED fc2 params (see init_params)."""
    B, in_dim = x.shape
    out_dim = w2n.shape[1]

    if compute_dtype is None:
        compute_dtype = _default_compute_dtype()

    vmem_cap = _vmem_capacity_bytes()
    big_vmem = vmem_cap >= (96 << 20)
    if block_b is None:
        block_b = 8192 if big_vmem else 4096        # 4096 on v7x (64 MiB/TC)
    vmem_limit = (100 << 20) if big_vmem else (48 << 20)

    # Batch tile: at least 2 (even number of) grid steps when possible so the
    # "parallel" axis shards across both TensorCores on v7x; rows a multiple
    # of 16 (bf16 sublane packing); minimal padding for awkward B.
    n_steps = max(2, -(-B // block_b))
    if n_steps % 2:
        n_steps += 1
    tb = min(block_b, _round_up(-(-B // n_steps), 16))
    grid = -(-B // tb)
    b_padded = grid * tb

    # fc1 operands in the compute dtype (also halves the x HBM stream on
    # v6e/v7x).  Weight/bias casts are tiny one-off ops.
    x = x.astype(compute_dtype)
    if b_padded != B:
        x = jnp.pad(x, ((0, b_padded - B), (0, 0)))
    w1c = w1.astype(compute_dtype)
    b1c = b1.astype(compute_dtype)

    kernel = functools.partial(netl1_kernel, epilogue_dtype=compute_dtype)

    out = pl.pallas_call(
        kernel,
        out_shape=jax.ShapeDtypeStruct((b_padded, out_dim), jnp.bfloat16),
        grid=(grid,),
        in_specs=[
            pl.BlockSpec((tb, in_dim), lambda i: (i, 0)),   # x: streamed
            pl.BlockSpec(w1c.shape, lambda i: (0, 0)),      # weights/biases
            pl.BlockSpec(b1c.shape, lambda i: (0, 0)),      # stay VMEM-resident
            pl.BlockSpec(w2n.shape, lambda i: (0, 0)),
            pl.BlockSpec(b2n.shape, lambda i: (0, 0)),
        ],
        out_specs=pl.BlockSpec((tb, out_dim), lambda i: (i, 0)),
        compiler_params=pltpu.CompilerParams(
            dimension_semantics=("parallel",),
            vmem_limit_bytes=vmem_limit),
    )(x, w1c, b1c, w2n, b2n)
    return out[:B]


def init_params(key):
    # Deterministic init mimicking nn.Linear's uniform(-1/sqrt(fan_in), ...).
    k1, k2, k3, k4 = jax.random.split(key, 4)
    bound1 = 1.0 / jnp.sqrt(2.0)
    bound2 = 1.0 / jnp.sqrt(512.0)
    w1 = jax.random.uniform(k1, (2, 512), jnp.float32, -bound1, bound1)
    b1 = jax.random.uniform(k2, (1, 512), jnp.float32, -bound1, bound1)
    w2 = jax.random.uniform(k3, (512, 256), jnp.float32, -bound2, bound2)
    b2 = jax.random.uniform(k4, (1, 256), jnp.float32, -bound2, bound2)
    # One-time parameter transform: store fc2 params negated (and W2 in bf16,
    # the native MXU input format) so the kernel computes
    #   sigmoid(h @ W2 + b2) = 1 / (1 + exp(h @ (-W2) + (-b2)))
    # without a per-tile negate of the (tb, 256) logits.
    w2n = (-w2).astype(jnp.bfloat16)
    b2n = -b2
    return w1, b1, w2n, b2n


def reference_forward(x, w1, b1, w2n, b2n):
    # Reference in f32 math using the same (bf16-quantized) W2 the kernel sees.
    w2 = -w2n.astype(jnp.float32)
    b2 = -b2n
    h = jnp.maximum(x @ w1 + b1, 0.0)
    return jax.nn.sigmoid(h @ w2 + b2)


if __name__ == "__main__":
    key = jax.random.PRNGKey(0)
    kx, kp = jax.random.split(key)
    params = init_params(kp)

    # Small batch of (u, v) coordinate pairs.
    B = 8
    x = jax.random.uniform(kx, (B, 2), jnp.float32)
    out = jax.block_until_ready(netl1_forward(x, *params))
    ref = reference_forward(x, *params)
    assert out.shape == (B, 256)
    assert out.dtype == jnp.bfloat16
    assert jnp.allclose(out.astype(jnp.float32), ref, atol=1e-2, rtol=1e-2)

    # Exercise the batched/tiled path (padding + multi-step grid / megacore).
    B2 = 2000
    x2 = jax.random.uniform(jax.random.PRNGKey(1), (B2, 2), jnp.float32)
    out2 = jax.block_until_ready(netl1_forward(x2, *params))
    ref2 = reference_forward(x2, *params)
    assert out2.shape == (B2, 256)
    assert jnp.allclose(out2.astype(jnp.float32), ref2, atol=1e-2, rtol=1e-2)

    print("KERNEL_OK")
</pallas_src>

<mosaic_0001>
module attributes {stable_mosaic.version = 11 : i64} {
  func.func @netl1_kernel(%arg0: i32, %arg1: memref<16x2xf32, #tpu.memory_space<vmem>>, %arg2: memref<2x512xf32, #tpu.memory_space<vmem>>, %arg3: memref<1x512xf32, #tpu.memory_space<vmem>>, %arg4: memref<512x256xbf16, #tpu.memory_space<vmem>>, %arg5: memref<1x256xf32, #tpu.memory_space<vmem>>, %arg6: memref<16x256xbf16, #tpu.memory_space<vmem>>) attributes {dimension_semantics = [#tpu.dimension_semantics<parallel>], iteration_bounds = array<i64: 1>, scalar_prefetch = 0 : i64, scratch_operands = 0 : i64, tpu.core_type = #tpu.core_type<tc>, window_params = [{transform_indices = @transform_0, window_bounds = array<i64: 16, 2>}, {pipeline_mode = #tpu.pipeline_mode<synchronous>, transform_indices = @transform_1, window_bounds = array<i64: 2, 512>}, {pipeline_mode = #tpu.pipeline_mode<synchronous>, transform_indices = @transform_2, window_bounds = array<i64: 1, 512>}, {pipeline_mode = #tpu.pipeline_mode<synchronous>, transform_indices = @transform_3, window_bounds = array<i64: 512, 256>}, {pipeline_mode = #tpu.pipeline_mode<synchronous>, transform_indices = @transform_4, window_bounds = array<i64: 1, 256>}, {transform_indices = @transform_5, window_bounds = array<i64: 16, 256>}]} {
    %c0 = arith.constant 0 : index
    %c0_0 = arith.constant 0 : index
    %0 = vector.load %arg1[%c0, %c0_0] : memref<16x2xf32, #tpu.memory_space<vmem>>, vector<16x2xf32>
    %c0_1 = arith.constant 0 : index
    %c0_2 = arith.constant 0 : index
    %1 = vector.load %arg2[%c0_1, %c0_2] : memref<2x512xf32, #tpu.memory_space<vmem>>, vector<2x512xf32>
    %2 = vector.extract_strided_slice %0 {offsets = [0, 0], sizes = [16, 1], strides = [1, 1]} : vector<16x2xf32> to vector<16x1xf32>
    %3 = vector.extract_strided_slice %1 {offsets = [0, 0], sizes = [1, 512], strides = [1, 1]} : vector<2x512xf32> to vector<1x512xf32>
    %4 = vector.broadcast %2 : vector<16x1xf32> to vector<16x512xf32>
    %5 = vector.broadcast %3 : vector<1x512xf32> to vector<16x512xf32>
    %6 = arith.mulf %4, %5 : vector<16x512xf32>
    %7 = vector.extract_strided_slice %0 {offsets = [0, 1], sizes = [16, 1], strides = [1, 1]} : vector<16x2xf32> to vector<16x1xf32>
    %8 = vector.extract_strided_slice %1 {offsets = [1, 0], sizes = [1, 512], strides = [1, 1]} : vector<2x512xf32> to vector<1x512xf32>
    %9 = vector.broadcast %7 : vector<16x1xf32> to vector<16x512xf32>
    %10 = vector.broadcast %8 : vector<1x512xf32> to vector<16x512xf32>
    %11 = arith.mulf %9, %10 : vector<16x512xf32>
    %12 = arith.addf %6, %11 : vector<16x512xf32>
    %c0_3 = arith.constant 0 : index
    %c0_4 = arith.constant 0 : index
    %13 = vector.load %arg3[%c0_3, %c0_4] : memref<1x512xf32, #tpu.memory_space<vmem>>, vector<1x512xf32>
    %14 = vector.broadcast %13 : vector<1x512xf32> to vector<16x512xf32>
    %15 = arith.addf %12, %14 : vector<16x512xf32>
    %cst = arith.constant 0.000000e+00 : f32
    %16 = vector.broadcast %cst : f32 to vector<16x512xf32>
    %17 = arith.maximumf %15, %16 : vector<16x512xf32>
    %18 = arith.truncf %17 : vector<16x512xf32> to vector<16x512xbf16>
    %c0_5 = arith.constant 0 : index
    %c0_6 = arith.constant 0 : index
    %19 = vector.load %arg4[%c0_5, %c0_6] : memref<512x256xbf16, #tpu.memory_space<vmem>>, vector<512x256xbf16>
    %cst_7 = arith.constant dense<0.000000e+00> : vector<16x256xf32>
    %20 = tpu.matmul %18, %19, %cst_7 {dimension_numbers = #tpu.dot_dimension_numbers<[1], [0], [0], [1], [0, 0, 1, 1], [], []>} : vector<16x512xbf16>, vector<512x256xbf16>, vector<16x256xf32> -> vector<16x256xf32>
    %c0_8 = arith.constant 0 : index
    %c0_9 = arith.constant 0 : index
    %21 = vector.load %arg5[%c0_8, %c0_9] : memref<1x256xf32, #tpu.memory_space<vmem>>, vector<1x256xf32>
    %22 = vector.broadcast %21 : vector<1x256xf32> to vector<16x256xf32>
    %23 = arith.addf %20, %22 : vector<16x256xf32>
    %24 = math.exp %23 : vector<16x256xf32>
    %cst_10 = arith.constant 1.000000e+00 : f32
    %25 = vector.broadcast %cst_10 : f32 to vector<16x256xf32>
    %26 = arith.addf %25, %24 : vector<16x256xf32>
    %27 = tpu.reciprocal %26 {approx = true} : vector<16x256xf32> -> vector<16x256xf32>
    %28 = arith.truncf %27 : vector<16x256xf32> to vector<16x256xbf16>
    %c0_11 = arith.constant 0 : index
    %c0_12 = arith.constant 0 : index
    %29 = vector.load %arg6[%c0_11, %c0_12] : memref<16x256xbf16, #tpu.memory_space<vmem>>, vector<16x256xbf16>
    tpu.vector_store %arg6[%c0_11, %c0_12], %28 {strides = array<i32>} : memref<16x256xbf16, #tpu.memory_space<vmem>>, vector<16x256xbf16>,
    return
  }
  func.func @transform_0(%arg0: i32) -> (i32, i32) {
    %c0_i32 = arith.constant 0 : i32
    %c0_i32_0 = arith.constant 0 : i32
    return %arg0, %c0_i32 : i32, i32
  }
  func.func @transform_1(%arg0: i32) -> (i32, i32) {
    %c0_i32 = arith.constant 0 : i32
    %c0_i32_0 = arith.constant 0 : i32
    %c0_i32_1 = arith.constant 0 : i32
    return %c0_i32, %c0_i32_0 : i32, i32
  }
  func.func @transform_2(%arg0: i32) -> (i32, i32) {
    %c0_i32 = arith.constant 0 : i32
    %c0_i32_0 = arith.constant 0 : i32
    %c0_i32_1 = arith.constant 0 : i32
    return %c0_i32, %c0_i32_0 : i32, i32
  }
  func.func @transform_3(%arg0: i32) -> (i32, i32) {
    %c0_i32 = arith.constant 0 : i32
    %c0_i32_0 = arith.constant 0 : i32
    %c0_i32_1 = arith.constant 0 : i32
    return %c0_i32, %c0_i32_0 : i32, i32
  }
  func.func @transform_4(%arg0: i32) -> (i32, i32) {
    %c0_i32 = arith.constant 0 : i32
    %c0_i32_0 = arith.constant 0 : i32
    %c0_i32_1 = arith.constant 0 : i32
    return %c0_i32, %c0_i32_0 : i32, i32
  }
  func.func @transform_5(%arg0: i32) -> (i32, i32) {
    %c0_i32 = arith.constant 0 : i32
    %c0_i32_0 = arith.constant 0 : i32
    return %arg0, %c0_i32 : i32, i32
  }
}

</mosaic_0001>

<bundles_post_ra>
// kernel: tpu_custom_call.1
= control target key start
LH: loop header
LB: loop body
LE: loop exit
PB: predicated region body
PF: predicated region fallthrough
CT: control target
= control target key end

     0   :  { %10 = vsyncpa [#allocation3], 0  ;;  %s1254_s0 = inlined_call_operand.hbm [shape: f32[16,2], index: 0, kind: input, shape index: {}]   ;;  %s1255_s1 = inlined_call_operand.hbm [shape: f32[2,512], index: 1, kind: input, shape index: {}]   ;;  %s1256_s2 = inlined_call_operand.hbm [shape: f32[1,512], index: 2, kind: input, shape index: {}]   ;;  %s1257_s3 = inlined_call_operand.hbm [shape: bf16[512,256], index: 3, kind: input, shape index: {}]   ;;  %s1258_s4 = inlined_call_operand.hbm [shape: f32[1,256], index: 4, kind: input, shape index: {}]   ;;  %s1259_s5 = inlined_call_operand.hbm [shape: bf16[16,256], index: 5, kind: output, shape index: {}]  }
   0x1   :  { %11 = vsyncpa [#allocation6], 0 }
   0x2   :  { %12 = vsyncpa [#allocation9], 0 }
   0x3   :  { %13 = vsyncpa [#allocation4], 0  ;;  %s1115_s18 = smov [#allocation5]   ;;  %s975_s22 = scalar_lea.hbm %s1255_s1, 128 }
   0x4   :  { %s32_s19 = sshll.u32 %s1115_s18, 4  ;;  %p976_p0 = scmp.ne.s32.totalorder %s1255_s1, %s975_s22  ;;  %s33_s19 = int_to_ptr.vmem [resolvable:$true] %s32_s19 }
   0x5   :  { %p979_p1 = scmp.lt.u32.totalorder %s975_s22, %s1255_s1 }
   0x7   :  { %p981_p2 = pnand %p979_p1, %p976_p0 }
   0x9   :  { %984 = shalt.err (!%p981_p2)
}
   0xa   :  { %s985_s27 = scalar_lea.vmem %s33_s19, 128  ;;  %p990_p4 = scmp.lt.s32.totalorder %s33_s19, %s33_s19 }
   0xb   :  { %p986_p3 = scmp.ne.s32.totalorder %s33_s19, %s985_s27  ;;  %p991_p5 = scmp.lt.s32.totalorder %s985_s27, %s985_s27 }
   0xd   :  { %p992_p6 = por %p991_p5, %p990_p4 }
   0xf   :  { %p993_p7 = pnand %p992_p6, %p986_p3 }
  0x11   :  { %996 = shalt.err (!%p993_p7)
}
  0x12   :  { %35 = dma.hbm_to_vmem [thread:$0]  %s1255_s1, 128, %s33_s19, [#allocation6]  }
  0x13   :  { %s1116_s30 = smov [#allocation8]   ;;  %s1117_s7 = smov [#allocation2]  }
  0x14   :  { %s51_s6 = sshll.u32 %s1116_s30, 4  ;;  %s19_s8 = sshll.u32 %s1117_s7, 4  ;;  %s52_s6 = int_to_ptr.vmem [resolvable:$true] %s51_s6  ;;  %s20_s8 = int_to_ptr.vmem [resolvable:$true] %s19_s8 }
  0x15   :  { %s997_s11 = scalar_lea.hbm %s1257_s3, 8192 }
  0x16   :  { %p998_p8 = scmp.ne.s32.totalorder %s1257_s3, %s997_s11  ;;  %p1001_p9 = scmp.lt.u32.totalorder %s997_s11, %s1257_s3 }
  0x18   :  { %p1003_p10 = pnand %p1001_p9, %p998_p8 }
  0x1a   :  { %1006 = shalt.err (!%p1003_p10)
}
  0x1b   :  { %s1007_s1 = scalar_lea.vmem %s52_s6, 8192  ;;  %p1012_p12 = scmp.lt.s32.totalorder %s52_s6, %s52_s6 }
  0x1c   :  { %p1008_p11 = scmp.ne.s32.totalorder %s52_s6, %s1007_s1  ;;  %p1013_p13 = scmp.lt.s32.totalorder %s1007_s1, %s1007_s1 }
  0x1e   :  { %p1014_p0 = por %p1013_p13, %p1012_p12 }
  0x20   :  { %p1015_p1 = pnand %p1014_p0, %p1008_p11 }
  0x22   :  { %1018 = shalt.err (!%p1015_p1)
}
  0x23   :  { %s1118_s16 = smov 128   ;;  %s1119_s17 = smov 8  }
  0x24   :  { %57 = dma.hbm_to_vmem [thread:$0]  %s1257_s3, 8192, %s52_s6, [#allocation9], %s1118_s16, %s1118_s16, %s1119_s17  }
  0x25   :  { %s1019_s22 = scalar_lea.hbm %s1254_s0, 256 }
  0x26   :  { %p1020_p2 = scmp.ne.s32.totalorder %s1254_s0, %s1019_s22  ;;  %p1023_p3 = scmp.lt.u32.totalorder %s1019_s22, %s1254_s0 }
  0x28   :  { %p1025_p4 = pnand %p1023_p3, %p1020_p2 }
  0x2a   :  { %1028 = shalt.err (!%p1025_p4)
}
  0x2b   :  { %s1029_s27 = scalar_lea.vmem %s20_s8, 256  ;;  %p1034_p6 = scmp.lt.s32.totalorder %s20_s8, %s20_s8 }
  0x2c   :  { %p1030_p5 = scmp.ne.s32.totalorder %s20_s8, %s1029_s27  ;;  %p1035_p7 = scmp.lt.s32.totalorder %s1029_s27, %s1029_s27 }
  0x2e   :  { %p1036_p8 = por %p1035_p7, %p1034_p6 }
  0x30   :  { %p1037_p9 = pnand %p1036_p8, %p1030_p5 }
  0x32   :  { %1040 = shalt.err (!%p1037_p9)
}
  0x33   :  { %25 = dma.hbm_to_vmem [thread:$0]  %s1254_s0, 256, %s20_s8, [#allocation3], %s1118_s16, %s1118_s16, %s1119_s17  }
  0x34   :  { %s1120_s29 = smov [#allocation7]   ;;  %s1121_s6 = smov [#allocation10]  }
  0x35   :  { %s42_s30 = sshll.u32 %s1120_s29, 4  ;;  %s64_s7 = sshll.u32 %s1121_s6, 4  ;;  %s43_s30 = int_to_ptr.vmem [resolvable:$true] %s42_s30  ;;  %s65_s7 = int_to_ptr.vmem [resolvable:$true] %s64_s7 }
  0x36   :  { %s1041_s11 = scalar_lea.hbm %s1256_s2, 64 }
  0x37   :  { %p1042_p10 = scmp.ne.s32.totalorder %s1256_s2, %s1041_s11  ;;  %p1045_p11 = scmp.lt.u32.totalorder %s1041_s11, %s1256_s2 }
  0x39   :  { %p1047_p12 = pnand %p1045_p11, %p1042_p10 }
  0x3b   :  { %1050 = shalt.err (!%p1047_p12)
}
  0x3c   :  { %s1051_s0 = scalar_lea.vmem %s43_s30, 64  ;;  %p1056_p0 = scmp.lt.s32.totalorder %s43_s30, %s43_s30 }
  0x3d   :  { %p1052_p13 = scmp.ne.s32.totalorder %s43_s30, %s1051_s0  ;;  %p1057_p1 = scmp.lt.s32.totalorder %s1051_s0, %s1051_s0 }
  0x3f   :  { %p1058_p2 = por %p1057_p1, %p1056_p0 }
  0x41   :  { %p1059_p3 = pnand %p1058_p2, %p1052_p13 }
  0x43   :  { %1062 = shalt.err (!%p1059_p3)
}
  0x44   :  { %45 = dma.hbm_to_vmem [thread:$0]  %s1256_s2, 64, %s43_s30, [#allocation6]  }
  0x45   :  { %s1063_s20 = scalar_lea.hbm %s1258_s4, 32 }
  0x46   :  { %p1064_p4 = scmp.ne.s32.totalorder %s1258_s4, %s1063_s20  ;;  %p1067_p5 = scmp.lt.u32.totalorder %s1063_s20, %s1258_s4 }
  0x48   :  { %p1069_p6 = pnand %p1067_p5, %p1064_p4 }
  0x4a   :  { %1072 = shalt.err (!%p1069_p6)
}
  0x4b   :  { %s1073_s25 = scalar_lea.vmem %s65_s7, 32  ;;  %p1078_p8 = scmp.lt.s32.totalorder %s65_s7, %s65_s7 }
  0x4c   :  { %p1074_p7 = scmp.ne.s32.totalorder %s65_s7, %s1073_s25  ;;  %p1079_p9 = scmp.lt.s32.totalorder %s1073_s25, %s1073_s25 }
  0x4e   :  { %p1080_p10 = por %p1079_p9, %p1078_p8 }
  0x50   :  { %p1081_p11 = pnand %p1080_p10, %p1074_p7 }
  0x52   :  { %1084 = shalt.err (!%p1081_p11)
}
  0x53   :  { %67 = dma.hbm_to_vmem [thread:$0]  %s1258_s4, 32, %s65_s7, [#allocation9]  }
  0x54   :  { %1107 = dma.done.wait [#allocation3], 256  }
  0x55   :  { %1108 = vsyncadd [#allocation3], 4294967040 }
  0x56   :  { %1109 = dma.done.wait [#allocation6], 192  }
  0x57   :  { %1110 = vsyncadd [#allocation6], 4294967104 }
  0x58   :  { %1111 = dma.done.wait [#allocation9], 8224  }
  0x59   :  { %1112 = vsyncadd [#allocation9], 4294959072  ;;  %v1122_v0 = vmov 1   ;;  %v1123_v1 = vmov 0   ;;  %v83_v2 = vld [vmem:[#allocation2] sm:$0xff]  ;;  %v84_v3 = vld [vmem:[#allocation2 + $0x8] sm:$0xff] }
  0x5a   :  { %861 = vset.pattern.permute.xlu1 %v1122_v0  ;;  %860 = vset.pattern.permute.xlu0 %v1123_v1  ;;  %v863_v4 = vld [vmem:[#allocation8 + $0x4] ss:$8 sps:$4 sm:$0xff]   ;;  %v867_v6 = vld [vmem:[#allocation8] ss:$8 sps:$4 sm:$0xff]   ;;  %v869_v8 = vld [vmem:[#allocation8 + $0x14] ss:$8 sps:$4 sm:$0xff]  }
  0x5b   :  { %142 = vperm.xlu1 %861, %v83_v2   ;;  %88 = vperm.xlu0 %860, %v83_v2   ;;  %v865_v5 = vld [vmem:[#allocation8 + $0x104] ss:$8 sps:$4 sm:$0xff]   ;;  %v868_v7 = vld [vmem:[#allocation8 + $0x100] ss:$8 sps:$4 sm:$0xff]   ;;  %v871_v9 = vld [vmem:[#allocation8 + $0x114] ss:$8 sps:$4 sm:$0xff]  }
  0x5c   :  { %639 = vmatprep.subr.bf16.mxu1 %v863_v4  ;;  %682 = vmatprep.subr.bf16.mxu0 %v865_v5  ;;  %v873_v10 = vld [vmem:[#allocation8 + $0x10] ss:$8 sps:$4 sm:$0xff]   ;;  %v875_v12 = vld [vmem:[#allocation8 + $0x24] ss:$8 sps:$4 sm:$0xff]   ;;  %v879_v14 = vld [vmem:[#allocation8 + $0x20] ss:$8 sps:$4 sm:$0xff]   ;;  %v97_v4 = vlaneseq }
  0x5d   :  { %640 = vmatpush1.bf16.msra.mxu1 %v867_v6  ;;  %v874_v11 = vld [vmem:[#allocation8 + $0x110] ss:$8 sps:$4 sm:$0xff]   ;;  %683 = vmatpush1.bf16.msra.mxu0 %v868_v7  ;;  %v877_v13 = vld [vmem:[#allocation8 + $0x124] ss:$8 sps:$4 sm:$0xff]   ;;  %v881_v15 = vld [vmem:[#allocation8 + $0x34] ss:$8 sps:$4 sm:$0xff]  }
  0x5e   :  { %641 = vmatprep.subr.bf16.mxu1 %v869_v8  ;;  %684 = vmatprep.subr.bf16.mxu0 %v871_v9  ;;  %v880_v16 = vld [vmem:[#allocation8 + $0x120] ss:$8 sps:$4 sm:$0xff]   ;;  %v883_v17 = vld [vmem:[#allocation8 + $0x134] ss:$8 sps:$4 sm:$0xff]   ;;  %v885_v18 = vld [vmem:[#allocation8 + $0x30] ss:$8 sps:$4 sm:$0xff]  }
  0x5f   :  { %146 = vperm.xlu1 %861, %v84_v3   ;;  %93 = vperm.xlu0 %860, %v84_v3   ;;  %v887_v19 = vld [vmem:[#allocation8 + $0x44] ss:$8 sps:$4 sm:$0xff]   ;;  %v886_v20 = vld [vmem:[#allocation8 + $0x130] ss:$8 sps:$4 sm:$0xff]   ;;  %v891_v22 = vld [vmem:[#allocation8 + $0x40] ss:$8 sps:$4 sm:$0xff]  }
  0x60   :  { %v889_v21 = vld [vmem:[#allocation8 + $0x144] ss:$8 sps:$4 sm:$0xff]   ;;  %v893_v23 = vld [vmem:[#allocation8 + $0x54] ss:$8 sps:$4 sm:$0xff]   ;;  %v892_v24 = vld [vmem:[#allocation8 + $0x140] ss:$8 sps:$4 sm:$0xff]  }
  0x61   :  { %642 = vmatpush1.bf16.msra.mxu1 %v873_v10  ;;  %685 = vmatpush1.bf16.msra.mxu0 %v874_v11  ;;  %v895_v25 = vld [vmem:[#allocation8 + $0x154] ss:$8 sps:$4 sm:$0xff]   ;;  %v897_v26 = vld [vmem:[#allocation8 + $0x50] ss:$8 sps:$4 sm:$0xff]   ;;  %v899_v27 = vld [vmem:[#allocation8 + $0x64] ss:$8 sps:$4 sm:$0xff]  }
  0x62   :  { %643 = vmatprep.subr.bf16.mxu1 %v875_v12  ;;  %686 = vmatprep.subr.bf16.mxu0 %v877_v13  ;;  %v898_v28 = vld [vmem:[#allocation8 + $0x150] ss:$8 sps:$4 sm:$0xff]   ;;  %v901_v29 = vld [vmem:[#allocation8 + $0x164] ss:$8 sps:$4 sm:$0xff]   ;;  %v903_v30 = vld [vmem:[#allocation8 + $0x60] ss:$8 sps:$4 sm:$0xff]  }
  0x63   :  { %862 = vset.pattern.permute.xlu0 %v1122_v0  ;;  %v905_v31 = vld [vmem:[#allocation8 + $0x74] ss:$8 sps:$4 sm:$0xff]   ;;  %v904_v32 = vld [vmem:[#allocation8 + $0x160] ss:$8 sps:$4 sm:$0xff]   ;;  %v909_v34 = vld [vmem:[#allocation8 + $0x70] ss:$8 sps:$4 sm:$0xff]  }
  0x64   :  { %v907_v33 = vld [vmem:[#allocation8 + $0x174] ss:$8 sps:$4 sm:$0xff]   ;;  %v911_v35 = vld [vmem:[#allocation8 + $0x84] ss:$8 sps:$4 sm:$0xff]   ;;  %v910_v36 = vld [vmem:[#allocation8 + $0x170] ss:$8 sps:$4 sm:$0xff]  }
  0x65   :  { %644 = vmatpush1.bf16.msra.mxu1 %v879_v14  ;;  %687 = vmatpush1.bf16.msra.mxu0 %v880_v16  ;;  %v913_v37 = vld [vmem:[#allocation8 + $0x184] ss:$8 sps:$4 sm:$0xff]   ;;  %v915_v38 = vld [vmem:[#allocation8 + $0x80] ss:$8 sps:$4 sm:$0xff]   ;;  %v917_v39 = vld [vmem:[#allocation8 + $0x94] ss:$8 sps:$4 sm:$0xff]  }
  0x66   :  { %645 = vmatprep.subr.bf16.mxu1 %v881_v15  ;;  %688 = vmatprep.subr.bf16.mxu0 %v883_v17  ;;  %v916_v40 = vld [vmem:[#allocation8 + $0x180] ss:$8 sps:$4 sm:$0xff]   ;;  %v919_v41 = vld [vmem:[#allocation8 + $0x194] ss:$8 sps:$4 sm:$0xff]   ;;  %v921_v42 = vld [vmem:[#allocation8 + $0x90] ss:$8 sps:$4 sm:$0xff]  }
  0x67   :  { %v923_v43 = vld [vmem:[#allocation8 + $0xa4] ss:$8 sps:$4 sm:$0xff]   ;;  %v922_v44 = vld [vmem:[#allocation8 + $0x190] ss:$8 sps:$4 sm:$0xff]   ;;  %v927_v46 = vld [vmem:[#allocation8 + $0xa0] ss:$8 sps:$4 sm:$0xff]  }
  0x68   :  { %v925_v45 = vld [vmem:[#allocation8 + $0x1a4] ss:$8 sps:$4 sm:$0xff]   ;;  %v929_v47 = vld [vmem:[#allocation8 + $0xb4] ss:$8 sps:$4 sm:$0xff]   ;;  %v928_v48 = vld [vmem:[#allocation8 + $0x1a0] ss:$8 sps:$4 sm:$0xff]  }
  0x69   :  { %646 = vmatpush1.bf16.msra.mxu1 %v885_v18  ;;  %689 = vmatpush1.bf16.msra.mxu0 %v886_v20  ;;  %v931_v49 = vld [vmem:[#allocation8 + $0x1b4] ss:$8 sps:$4 sm:$0xff]   ;;  %v933_v50 = vld [vmem:[#allocation8 + $0xb0] ss:$8 sps:$4 sm:$0xff]   ;;  %v935_v51 = vld [vmem:[#allocation8 + $0xc4] ss:$8 sps:$4 sm:$0xff]  }
  0x6a   :  { %647 = vmatprep.subr.bf16.mxu1 %v887_v19  ;;  %690 = vmatprep.subr.bf16.mxu0 %v889_v21  ;;  %v934_v52 = vld [vmem:[#allocation8 + $0x1b0] ss:$8 sps:$4 sm:$0xff]   ;;  %v937_v53 = vld [vmem:[#allocation8 + $0x1c4] ss:$8 sps:$4 sm:$0xff]   ;;  %v939_v54 = vld [vmem:[#allocation8 + $0xc0] ss:$8 sps:$4 sm:$0xff]  }
  0x6b   :  { %v941_v55 = vld [vmem:[#allocation8 + $0xd4] ss:$8 sps:$4 sm:$0xff]   ;;  %v940_v56 = vld [vmem:[#allocation8 + $0x1c0] ss:$8 sps:$4 sm:$0xff]   ;;  %v945_v58 = vld [vmem:[#allocation8 + $0xd0] ss:$8 sps:$4 sm:$0xff]  }
  0x6c   :  { %v943_v57 = vld [vmem:[#allocation8 + $0x1d4] ss:$8 sps:$4 sm:$0xff]   ;;  %v947_v59 = vld [vmem:[#allocation8 + $0xe4] ss:$8 sps:$4 sm:$0xff]   ;;  %v946_v60 = vld [vmem:[#allocation8 + $0x1d0] ss:$8 sps:$4 sm:$0xff]  }
  0x6d   :  { %648 = vmatpush1.bf16.msra.mxu1 %v891_v22  ;;  %691 = vmatpush1.bf16.msra.mxu0 %v892_v24  ;;  %v949_v61 = vld [vmem:[#allocation8 + $0x1e4] ss:$8 sps:$4 sm:$0xff]   ;;  %v951_v62 = vld [vmem:[#allocation8 + $0xe0] ss:$8 sps:$4 sm:$0xff]   ;;  %v953_v63 = vld [vmem:[#allocation8 + $0xf4] ss:$8 sps:$4 sm:$0xff]  }
  0x6e   :  { %649 = vmatprep.subr.bf16.mxu1 %v893_v23  ;;  %692 = vmatprep.subr.bf16.mxu0 %v895_v25  ;;  %v952_v0 = vld [vmem:[#allocation8 + $0x1e0] ss:$8 sps:$4 sm:$0xff]   ;;  %v955_v1 = vld [vmem:[#allocation8 + $0x1f4] ss:$8 sps:$4 sm:$0xff]   ;;  %v957_v2 = vld [vmem:[#allocation8 + $0xf0] ss:$8 sps:$4 sm:$0xff]  }
  0x6f   :  { %v958_v3 = vld [vmem:[#allocation8 + $0x1f0] ss:$8 sps:$4 sm:$0xff]   ;;  %v98_v5 = vshrl.u32 %v97_v4, 7  ;;  %s1124_s4 = smov [#allocation11]  }
  0x70   :  { %v85_v10 = vld [vmem:[#allocation5] sm:$0xff]  ;;  %s760_s27 = sshll.u32 %s1124_s4, 4  ;;  %s761_s27 = int_to_ptr.vmem [resolvable:$true] %s760_s27 }
  0x71   :  { %650 = vmatpush1.bf16.msra.mxu1 %v897_v26  ;;  %693 = vmatpush1.bf16.msra.mxu0 %v898_v28  ;;  %v1221_v6 = vsub.s32 1, %v98_v5  ;;  %v159_v7 = vsub.s32 5, %v98_v5  ;;  %v1223_v8 = vsub.s32 0, %v98_v5  ;;  %v107_v9 = vsub.s32 4, %v98_v5  ;;  %s1085_s3 = scalar_lea.vmem %s761_s27, 256  ;;  %p1090_p13 = scmp.lt.s32.totalorder %s761_s27, %s761_s27 }
  0x72   :  { %651 = vmatprep.subr.bf16.mxu1 %v899_v27  ;;  %694 = vmatprep.subr.bf16.mxu0 %v901_v29  ;;  %v155_v11 = vsub.s32 3, %v98_v5  ;;  %v163_v12 = vsub.s32 7, %v98_v5  ;;  %v103_v13 = vsub.s32 2, %v98_v5  ;;  %v111_v14 = vsub.s32 6, %v98_v5  ;;  %v201_v27 = vld [vmem:[#allocation7] sm:$0xf]  ;;  %p1086_p12 = scmp.ne.s32.totalorder %s761_s27, %s1085_s3  ;;  %p1091_p0 = scmp.lt.s32.totalorder %s1085_s3, %s1085_s3 }
  0x73   :  { %v152_v15 = vrot.slane %v85_v10, %v1221_v6  ;;  %v160_v16 = vrot.slane %v85_v10, %v159_v7  ;;  %v100_v17 = vrot.slane %v85_v10, %v1223_v8  ;;  %v108_v18 = vrot.slane %v85_v10, %v107_v9 }
  0x74   :  { %v156_v19 = vrot.slane %v85_v10, %v155_v11  ;;  %v164_v20 = vrot.slane %v85_v10, %v163_v12  ;;  %v104_v21 = vrot.slane %v85_v10, %v103_v13  ;;  %v112_v22 = vrot.slane %v85_v10, %v111_v14  ;;  %p1092_p1 = por %p1091_p0, %p1090_p13 }
  0x75   :  { %652 = vmatpush1.bf16.msra.mxu1 %v903_v30  ;;  %695 = vmatpush1.bf16.msra.mxu0 %v904_v32  ;;  %v172_v23 = vrot.slane %v152_v15, %v1221_v6  ;;  %v180_v24 = vrot.slane %v160_v16, %v1221_v6  ;;  %v120_v25 = vrot.slane %v100_v17, %v1223_v8 }
  0x76   :  { %653 = vmatprep.subr.bf16.mxu1 %v905_v31  ;;  %696 = vmatprep.subr.bf16.mxu0 %v907_v33  ;;  %v128_v26 = vrot.slane %v108_v18, %v1223_v8  ;;  %v176_v28 = vrot.slane %v156_v19, %v1221_v6  ;;  %v184_v29 = vrot.slane %v164_v20, %v1221_v6  ;;  %p1093_p2 = pnand %p1092_p1, %p1086_p12 }
  0x77   :  { %v124_v30 = vrot.slane %v104_v21, %v1223_v8  ;;  %v132_v31 = vrot.slane %v112_v22, %v1223_v8  ;;  %v307_v22 = vld [vmem:[#allocation10] sm:$0x3] }
  0x79   :  { %654 = vmatpush1.bf16.msra.mxu1 %v909_v34  ;;  %697 = vmatpush1.bf16.msra.mxu0 %v910_v36  ;;  %v210_v34 = vrot.slane %v201_v27, %v1221_v6 }
  0x7a   :  { %655 = vmatprep.subr.bf16.mxu1 %v911_v35  ;;  %698 = vmatprep.subr.bf16.mxu0 %v913_v37  ;;  %v218_v35 = vrot.slane %v201_v27, %v155_v11 }
  0x7d   :  { %656 = vmatpush1.bf16.msra.mxu1 %v915_v38  ;;  %699 = vmatpush1.bf16.msra.mxu0 %v916_v40 }
  0x7e   :  { %657 = vmatprep.subr.bf16.mxu1 %v917_v39  ;;  %700 = vmatprep.subr.bf16.mxu0 %v919_v41 }
  0x81   :  { %658 = vmatpush1.bf16.msra.mxu1 %v921_v42  ;;  %701 = vmatpush1.bf16.msra.mxu0 %v922_v44 }
  0x82   :  { %659 = vmatprep.subr.bf16.mxu1 %v923_v43  ;;  %702 = vmatprep.subr.bf16.mxu0 %v925_v45  ;;  %v206_v45 = vrot.slane %v201_v27, %v1223_v8 }
  0x85   :  { %660 = vmatpush1.bf16.msra.mxu1 %v927_v46  ;;  %703 = vmatpush1.bf16.msra.mxu0 %v928_v48 }
  0x86   :  { %661 = vmatprep.subr.bf16.mxu1 %v929_v47  ;;  %704 = vmatprep.subr.bf16.mxu0 %v931_v49  ;;  %v214_v47 = vrot.slane %v201_v27, %v103_v13 }
  0x89   :  { %662 = vmatpush1.bf16.msra.mxu1 %v933_v50  ;;  %705 = vmatpush1.bf16.msra.mxu0 %v934_v52 }
  0x8a   :  { %663 = vmatprep.subr.bf16.mxu1 %v935_v51  ;;  %706 = vmatprep.subr.bf16.mxu0 %v937_v53 }
  0x8d   :  { %664 = vmatpush1.bf16.msra.mxu1 %v939_v54  ;;  %707 = vmatpush1.bf16.msra.mxu0 %v940_v56 }
  0x8e   :  { %665 = vmatprep.subr.bf16.mxu1 %v941_v55  ;;  %708 = vmatprep.subr.bf16.mxu0 %v943_v57 }
  0x91   :  { %666 = vmatpush1.bf16.msra.mxu1 %v945_v58  ;;  %709 = vmatpush1.bf16.msra.mxu0 %v946_v60 }
  0x92   :  { %667 = vmatprep.subr.bf16.mxu1 %v947_v59  ;;  %710 = vmatprep.subr.bf16.mxu0 %v949_v61 }
  0x95   :  { %668 = vmatpush1.bf16.msra.mxu1 %v951_v62  ;;  %711 = vmatpush1.bf16.msra.mxu0 %v952_v0 }
  0x96   :  { %669 = vmatprep.subr.bf16.mxu1 %v953_v63  ;;  %712 = vmatprep.subr.bf16.mxu0 %v955_v1 }
  0x99   :  { %670 = vmatpush1.bf16.msra.mxu1 %v957_v2  ;;  %713 = vmatpush1.bf16.msra.mxu0 %v958_v3 }
  0xda   :  { %v143_v32 = vpop.permute.xlu1 %142  ;;  %v89_v33 = vpop.permute.xlu0 %88 }
  0xdb   :  { %v185_v36 = vmul.f32 %v172_v23, %v143_v32  ;;  %v187_v37 = vmul.f32 %v180_v24, %v143_v32  ;;  %v133_v38 = vmul.f32 %v120_v25, %v89_v33  ;;  %v135_v39 = vmul.f32 %v128_v26, %v89_v33 }
  0xdc   :  { %v134_v40 = vmul.f32 %v124_v30, %v89_v33  ;;  %v186_v41 = vmul.f32 %v176_v28, %v143_v32  ;;  %v136_v42 = vmul.f32 %v132_v31, %v89_v33  ;;  %v188_v43 = vmul.f32 %v184_v29, %v143_v32 }
  0xdd   :  { %v193_v44 = vadd.f32 %v185_v36, %v133_v38  ;;  %v195_v46 = vadd.f32 %v187_v37, %v135_v39 }
  0xde   :  { %v147_v48 = vpop.permute.xlu1 %146  ;;  %v94_v49 = vpop.permute.xlu0 %93  ;;  %v194_v50 = vadd.f32 %v186_v41, %v134_v40  ;;  %v196_v51 = vadd.f32 %v188_v43, %v136_v42 }
  0xdf   :  { %v189_v52 = vmul.f32 %v172_v23, %v147_v48  ;;  %v190_v53 = vmul.f32 %v176_v28, %v147_v48  ;;  %v191_v54 = vmul.f32 %v180_v24, %v147_v48  ;;  %v192_v55 = vmul.f32 %v184_v29, %v147_v48 }
  0xe0   :  { %v137_v56 = vmul.f32 %v120_v25, %v94_v49  ;;  %v138_v57 = vmul.f32 %v124_v30, %v94_v49  ;;  %v139_v58 = vmul.f32 %v128_v26, %v94_v49  ;;  %v140_v59 = vmul.f32 %v132_v31, %v94_v49 }
  0xe1   :  { %v224_v60 = vadd.f32 %v210_v34, %v194_v50  ;;  %v226_v61 = vadd.f32 %v218_v35, %v196_v51  ;;  %v223_v62 = vadd.f32 %v206_v45, %v193_v44  ;;  %v225_v63 = vadd.f32 %v214_v47, %v195_v46 }
  0xe2   :  { %v197_v0 = vadd.f32 %v189_v52, %v137_v56  ;;  %v199_v1 = vadd.f32 %v191_v54, %v139_v58  ;;  %v198_v2 = vadd.f32 %v190_v53, %v138_v57  ;;  %v200_v3 = vadd.f32 %v192_v55, %v140_v59 }
  0xe3   :  { %v232_v10 = vmax.f32 %v224_v60, 0.0  ;;  %v234_v11 = vmax.f32 %v226_v61, 0.0  ;;  %v231_v12 = vmax.f32 %v223_v62, 0.0  ;;  %v233_v13 = vmax.f32 %v225_v63, 0.0 }
  0xe4   :  { %v228_v4 = vadd.f32 %v210_v34, %v198_v2  ;;  %v230_v5 = vadd.f32 %v218_v35, %v200_v3  ;;  %v227_v7 = vadd.f32 %v206_v45, %v197_v0  ;;  %v229_v9 = vadd.f32 %v214_v47, %v199_v1 }
  0xe5   :  { %v312_v23 = vrot.slane %v307_v22, %v1223_v8  ;;  %v316_v24 = vrot.slane %v307_v22, %v1221_v6 }
  0xe6   :  { %v236_v14 = vmax.f32 %v228_v4, 0.0  ;;  %v238_v15 = vmax.f32 %v230_v5, 0.0  ;;  %v235_v16 = vmax.f32 %v227_v7, 0.0  ;;  %v237_v17 = vmax.f32 %v229_v9, 0.0 }
  0xe8   :  { %v240_v18 = vpack.c.bf16 %v236_v14, %v232_v10  ;;  %v242_v19 = vpack.c.bf16 %v238_v15, %v234_v11  ;;  %v239_v20 = vpack.c.bf16 %v235_v16, %v231_v12  ;;  %v241_v21 = vpack.c.bf16 %v237_v17, %v233_v13 }
  0xea   :  { %671 = vmatprep.mubr.bf16.mxu1 %v240_v18  ;;  %714 = vmatprep.mubr.bf16.mxu0 %v242_v19 }
  0xeb   :  { %672 = vmatmul.mubr.bf16.vlgmr.msra.gmra.mrb[0].mxu1 %v239_v20  ;;  %715 = vmatmul.mubr.bf16.vlgmr.msra.gmra.mrb[0].mxu0 %v241_v21 }
 0x1be   :  { %v673_v25 = vpop.f32.mrb[0].mxu1  ;;  %v716_v26 = vpop.f32.mrb[0].mxu0 }
 0x1bf   :  { %v674_v27 = vadd.f32 %v673_v25, %v312_v23  ;;  %v675_v28 = vpop.f32.mrb[1].mxu1  ;;  %v718_v29 = vpop.f32.mrb[1].mxu0 }
 0x1c0   :  { %v676_v30 = vadd.f32 %v675_v28, %v316_v24  ;;  %v677_v31 = vpop.f32.mrb[2].mxu1  ;;  %v720_v32 = vpop.f32.mrb[2].mxu0 }
 0x1c1   :  { %v717_v33 = vadd.f32 %v716_v26, %v674_v27  ;;  %v678_v34 = vadd.f32 %v677_v31, %v312_v23  ;;  %v679_v35 = vpop.f32.mrb[3].mxu1  ;;  %v722_v36 = vpop.f32.mrb[3].mxu0 }
 0x1c2   :  { %v719_v37 = vadd.f32 %v718_v29, %v676_v30  ;;  %v680_v38 = vadd.f32 %v679_v35, %v316_v24 }
 0x1c3   :  { %v725_v39 = vmul.f32 1.442695, %v717_v33  ;;  %v721_v40 = vadd.f32 %v720_v32, %v678_v34 }
 0x1c4   :  { %v727_v41 = vmul.f32 1.442695, %v719_v37  ;;  %v723_v8 = vadd.f32 %v722_v36, %v680_v38 }
 0x1c5   :  { %959 = vpow2.f32 %v725_v39  ;;  %v729_v6 = vmul.f32 1.442695, %v721_v40 }
 0x1c6   :  { %961 = vpow2.f32 %v727_v41  ;;  %v731_v42 = vmul.f32 1.442695, %v723_v8 }
 0x1c7   :  { %963 = vpow2.f32 %v729_v6 }
 0x1c8   :  { %965 = vpow2.f32 %v731_v42 }
 0x1cf   :  { %v960_v43 = vpop.eup %959 }
 0x1d0   :  { %v962_v44 = vpop.eup %961  ;;  %v733_v45 = vadd.f32 1.0, %v960_v43 }
 0x1d1   :  { %v964_v46 = vpop.eup %963  ;;  %v734_v47 = vadd.f32 1.0, %v962_v44 }
 0x1d2   :  { %v966_v48 = vpop.eup %965  ;;  %967 = vrcp.f32 %v733_v45  ;;  %v735_v49 = vadd.f32 1.0, %v964_v46 }
 0x1d3   :  { %969 = vrcp.f32 %v734_v47  ;;  %v736_v50 = vadd.f32 1.0, %v966_v48 }
 0x1d4   :  { %971 = vrcp.f32 %v735_v49 }
 0x1d5   :  { %973 = vrcp.f32 %v736_v50 }
 0x1dc   :  { %v968_v51 = vpop.eup %967 }
 0x1dd   :  { %v970_v52 = vpop.eup %969 }
 0x1de   :  { %v972_v53 = vpop.eup %971  ;;  %v840_v54 = vpack.c.bf16 %v970_v52, %v968_v51 }
 0x1df   :  { %v974_v55 = vpop.eup %973 }
 0x1e0   :  { %v841_v56 = vpack.c.bf16 %v974_v55, %v972_v53  ;;  %753 = vst [vmem:[#allocation11] sm:$0xff] %v840_v54 }
 0x1e2   :  { %754 = vst [vmem:[#allocation11 + $0x8] sm:$0xff] %v841_v56 }
 0x1e3   :  { %1096 = shalt.err (!%p1093_p2)
}
 0x1e4   :  { %s1097_s30 = scalar_lea.hbm %s1259_s5, 256 }
 0x1e5   :  { %p1098_p3 = scmp.ne.s32.totalorder %s1259_s5, %s1097_s30  ;;  %p1101_p4 = scmp.lt.u32.totalorder %s1097_s30, %s1259_s5 }
 0x1e7   :  { %p1103_p5 = pnand %p1101_p4, %p1098_p3 }
 0x1e9   :  { %1106 = shalt.err (!%p1103_p5)
}
 0x1ea   :  { %766 = dma.vmem_to_hbm [thread:$0]  %s761_s27, 256, %s1259_s5, [#allocation4], %s1118_s16, %s1118_s16, %s1119_s17  }
 0x1eb   :  { %1113 = dma.done.wait [#allocation4], 256  }
 0x1ec   :  { %1114 = vsyncadd [#allocation4], 4294967040 }
 0x1ed   :  { %770 = vsyncpa [#allocation3], 1 }
 0x1ee   :  { %771 = vsyncpa [#allocation6], 1 }
 0x1ef   :  { %772 = vsyncpa [#allocation9], 1 }
 0x1f0   :  { %773 = vsyncpa [#allocation4], 1 }

</bundles_post_ra>
